<compile_context>
chip_gen: v7x
topology: tpu7x:2x2x1
jax: 0.10.0
libtpu: 0.0.40
codegen_flags: <defaults>
</compile_context>

<pallas_src>
import functools
import math

import jax
import jax.numpy as jnp
from jax import lax
from jax.experimental import pallas as pl
from jax.experimental.pallas import tpu as pltpu

MIX_NOISE = 1
MAX_VAR = 0.02


# ---------------------------------------------------------------------------
# Phase 1: fused projection + attention + var (single program, VMEM resident).
# TODO(synk): for the real embed_size=1536 / long-sequence regime this phase
# should be gridded over token tiles with a flash-style online softmax and a
# pl.when max-accumulator, plus an explicit vmem_limit_bytes.
# ---------------------------------------------------------------------------
def attn_var_kernel(x_ref, w_ref, b_ref, var_ref, *, batch, seq, embed, max_var):
    x = x_ref[...]                                              # (B*S, E) bf16
    # One MXU matmul, f32 accumulation: columns = [ Q | K | fc-col + zero pad ].
    p = jnp.dot(x, w_ref[...], preferred_element_type=jnp.float32) + b_ref[...]

    q = p[:, :embed].reshape(batch, seq, embed)
    k = p[:, embed:2 * embed].reshape(batch, seq, embed)
    g = p[:, 2 * embed:].reshape(batch, seq, -1)   # (B,S,128); col 0 = fc term, rest exact 0

    inv_sqrt_e = jnp.float32(1.0 / math.sqrt(embed))
    scores = jnp.einsum('bqe,bke->bqk',
                        q.astype(jnp.bfloat16), k.astype(jnp.bfloat16),
                        preferred_element_type=jnp.float32) * inv_sqrt_e

    # Softmax in f32.
    m = jnp.max(scores, axis=-1, keepdims=True)
    e = jnp.exp(scores - m)
    attn = e / jnp.sum(e, axis=-1, keepdims=True)

    # fc_var folded through attention (f32 for the max/clamp path).
    fcpad = jnp.einsum('bqk,bkf->bqf', attn, g,
                       preferred_element_type=jnp.float32)      # (B,S,128)
    fc2d = fcpad.reshape(batch * seq, -1)
    # Zero pad columns implement relu's floor: max(fc, 0-columns) == relu(max(fc)).
    raw = jnp.max(jnp.max(fc2d, axis=1, keepdims=True), axis=0, keepdims=True)  # (1,1)
    var_ref[...] = jnp.minimum(raw, jnp.float32(max_var))


# ---------------------------------------------------------------------------
# Phase 2: gridded noise generation in the final (B, mix, S, E) layout.
# ---------------------------------------------------------------------------
def _mix_bits(cnt, seed, stream):
    """Murmur/PCG-style 32-bit integer mix; pure VPU int ops (no pltpu PRNG)."""
    x = cnt * jnp.uint32(0x9E3779B1) + seed + stream
    x = x ^ (x >> 16)
    x = x * jnp.uint32(0x7FEB352D)
    x = x ^ (x >> 15)
    x = x * jnp.uint32(0x846CA68B)
    x = x ^ (x >> 16)
    return x


def _bits_to_unit(bits):
    """uint32 bits -> uniform [0,1) via the exponent trick (no int->float cvt)."""
    one_two = lax.bitcast_convert_type((bits >> 9) | jnp.uint32(0x3F800000),
                                       jnp.float32)
    return one_two - jnp.float32(1.0)


def noise_kernel(var_ref, seed_ref, scale_ref, noise_ref, *, seq, seq_tile, embed, mix):
    b = pl.program_id(0)
    k = pl.program_id(1)
    t = pl.program_id(2)

    half = seq_tile // 2
    # Unique pair counter per (batch, mix, global row-pair, lane): grid tiles
    # can never repeat noise, and the stream is seed-deterministic.
    # TODO(synk): widen to a 64-bit / re-keyed counter if B*mix*S*E/2 > 2**31.
    base = ((b * mix + k) * (seq // 2) + t * half) * embed
    rows = lax.broadcasted_iota(jnp.int32, (half, embed), 0)
    cols = lax.broadcasted_iota(jnp.int32, (half, embed), 1)
    cnt = lax.bitcast_convert_type(base + rows * embed + cols, jnp.uint32)
    seed = lax.bitcast_convert_type(seed_ref[0], jnp.uint32)

    u1 = _bits_to_unit(_mix_bits(cnt, seed, jnp.uint32(0x6A09E667)))
    u2 = _bits_to_unit(_mix_bits(cnt, seed, jnp.uint32(0xBB67AE85)))

    std = var_ref[0, 0] * scale_ref[k]                       # f32 scalar: var * 1.1**k
    r = std * jnp.sqrt(jnp.float32(-2.0) * jnp.log(jnp.float32(1.0) - u1))
    theta = jnp.float32(2.0 * math.pi) * u2

    # Both Box-Muller halves -> one (log, sqrt, cos, sin) per TWO output elements.
    noise_ref[:, :, 0:half, :] = (r * jnp.cos(theta)).reshape(1, 1, half, embed)
    noise_ref[:, :, half:seq_tile, :] = (r * jnp.sin(theta)).reshape(1, 1, half, embed)


# ---------------------------------------------------------------------------
# Wrapper
# ---------------------------------------------------------------------------
def adaptive_noise_forward(x, params, seed, *, max_var=MAX_VAR, mix_noise=MIX_NOISE):
    B, S, E = x.shape
    assert E % 128 == 0 and S % 2 == 0

    # --- one-time parameter fusion (pre-transposed so the kernel contracts ---
    # --- x's last dim against the weight's FIRST dim; bf16 for the MXU)   ---
    wq_t = params['wq'].T                                   # (E, E)
    wk_t = params['wk'].T                                   # (E, E)
    wvar_col = params['wvar'].T                             # (E, 1)
    fc_col = params['wv'].T @ wvar_col                      # (E, 1) = Wv^T wvar^T
    fc_block = jnp.pad(fc_col, ((0, 0), (0, 127)))          # (E, 128), zero padded
    w_fused = jnp.concatenate([wq_t, wk_t, fc_block], axis=1).astype(jnp.bfloat16)

    fc_const = (params['bv'] @ wvar_col)[0, 0] + params['bvar'][0, 0]
    b_fc = jnp.zeros((1, 128), jnp.float32).at[0, 0].set(fc_const)
    b_fused = jnp.concatenate([params['bq'], params['bk'], b_fc], axis=1)  # (1, 2E+128) f32

    x2d = x.reshape(B * S, E).astype(jnp.bfloat16)

    vmem = pl.BlockSpec(memory_space=pltpu.MemorySpace.VMEM)
    smem = pl.BlockSpec(memory_space=pltpu.MemorySpace.SMEM)

    # --- phase 1: attention + var (scalar) -----------------------------------
    var = pl.pallas_call(
        functools.partial(attn_var_kernel, batch=B, seq=S, embed=E, max_var=max_var),
        out_shape=jax.ShapeDtypeStruct((1, 1), jnp.float32),
        in_specs=[vmem, vmem, vmem],
        out_specs=vmem,
    )(x2d, w_fused, b_fused)

    # --- phase 2: gridded noise generation ------------------------------------
    seq_tile = S if S <= 512 else 512
    assert S % seq_tile == 0 and seq_tile % 2 == 0
    scale_tab = jnp.array([1.1 ** kk for kk in range(mix_noise)], dtype=jnp.float32)

    noise = pl.pallas_call(
        functools.partial(noise_kernel, seq=S, seq_tile=seq_tile, embed=E, mix=mix_noise),
        out_shape=jax.ShapeDtypeStruct((B, mix_noise, S, E), jnp.float32),
        grid=(B, mix_noise, S // seq_tile),
        in_specs=[smem, smem, smem],                       # var, seed, scale table
        out_specs=pl.BlockSpec((1, 1, seq_tile, E), lambda b, k, t: (b, k, t, 0)),
        compiler_params=pltpu.CompilerParams(
            dimension_semantics=("parallel", "parallel", "parallel")),
    )(var, seed, scale_tab)

    return noise, var[0, 0]


def init_params(key, E):
    """Deterministic synthetic params (PyTorch Linear-style uniform init)."""
    ks = jax.random.split(key, 8)
    s = 1.0 / math.sqrt(E)
    u = lambda k, shape: jax.random.uniform(k, shape, jnp.float32, -s, s)
    return dict(
        wq=u(ks[0], (E, E)), bq=u(ks[1], (1, E)),
        wk=u(ks[2], (E, E)), bk=u(ks[3], (1, E)),
        wv=u(ks[4], (E, E)), bv=u(ks[5], (1, E)),
        wvar=u(ks[6], (1, E)), bvar=u(ks[7], (1, 1)),
    )


if __name__ == "__main__":
    B, S, E = 2, 8, 128
    key = jax.random.PRNGKey(0)
    kx, kp = jax.random.split(key)
    x = jax.random.normal(kx, (B, S, E), dtype=jnp.float32)
    params = init_params(kp, E)
    seed = jnp.array([1234], dtype=jnp.int32)

    noise, var = adaptive_noise_forward(x, params, seed)
    jax.block_until_ready((noise, var))

    assert noise.shape == (B, MIX_NOISE, S, E), noise.shape
    assert 0.0 <= float(var) <= MAX_VAR + 1e-6, float(var)
    assert bool(jnp.isfinite(noise).all())
    print("KERNEL_OK")
</pallas_src>

<mosaic_0001>
module attributes {stable_mosaic.version = 11 : i64} {
  func.func @attn_var_kernel(%arg0: memref<16x128xbf16, #tpu.memory_space<vmem>>, %arg1: memref<128x384xbf16, #tpu.memory_space<vmem>>, %arg2: memref<1x384xf32, #tpu.memory_space<vmem>>, %arg3: memref<1x1xf32, #tpu.memory_space<vmem>>) attributes {dimension_semantics = [], scalar_prefetch = 0 : i64, scratch_operands = 0 : i64, tpu.core_type = #tpu.core_type<tc>} {
    %c0 = arith.constant 0 : index
    %c0_0 = arith.constant 0 : index
    %0 = vector.load %arg0[%c0, %c0_0] : memref<16x128xbf16, #tpu.memory_space<vmem>>, vector<16x128xbf16>
    %c0_1 = arith.constant 0 : index
    %c0_2 = arith.constant 0 : index
    %1 = vector.load %arg1[%c0_1, %c0_2] : memref<128x384xbf16, #tpu.memory_space<vmem>>, vector<128x384xbf16>
    %cst = arith.constant dense<0.000000e+00> : vector<16x384xf32>
    %2 = tpu.matmul %0, %1, %cst {dimension_numbers = #tpu.dot_dimension_numbers<[1], [0], [0], [1], [0, 0, 1, 1], [], []>} : vector<16x128xbf16>, vector<128x384xbf16>, vector<16x384xf32> -> vector<16x384xf32>
    %c0_3 = arith.constant 0 : index
    %c0_4 = arith.constant 0 : index
    %3 = vector.load %arg2[%c0_3, %c0_4] : memref<1x384xf32, #tpu.memory_space<vmem>>, vector<1x384xf32>
    %4 = vector.broadcast %3 : vector<1x384xf32> to vector<16x384xf32>
    %5 = arith.addf %2, %4 : vector<16x384xf32>
    %6 = vector.extract_strided_slice %5 {offsets = [0, 0], sizes = [16, 128], strides = [1, 1]} : vector<16x384xf32> to vector<16x128xf32>
    %7 = vector.shape_cast %6 : vector<16x128xf32> to vector<2x8x128xf32>
    %8 = vector.extract_strided_slice %5 {offsets = [0, 128], sizes = [16, 128], strides = [1, 1]} : vector<16x384xf32> to vector<16x128xf32>
    %9 = vector.shape_cast %8 : vector<16x128xf32> to vector<2x8x128xf32>
    %10 = vector.extract_strided_slice %5 {offsets = [0, 256], sizes = [16, 128], strides = [1, 1]} : vector<16x384xf32> to vector<16x128xf32>
    %11 = vector.shape_cast %10 : vector<16x128xf32> to vector<2x8x128xf32>
    %12 = arith.truncf %7 : vector<2x8x128xf32> to vector<2x8x128xbf16>
    %13 = arith.truncf %9 : vector<2x8x128xf32> to vector<2x8x128xbf16>
    "tpu.trace_start"() <{level = 10 : i32, message = "bqe,bke->bqk"}> : () -> ()
    %cst_5 = arith.constant dense<0.000000e+00> : vector<2x8x8xf32>
    %14 = tpu.matmul %12, %13, %cst_5 {dimension_numbers = #tpu.dot_dimension_numbers<[2], [2], [1], [1], [0, 0, 0, 1, 1, 1], [0], [0]>} : vector<2x8x128xbf16>, vector<2x8x128xbf16>, vector<2x8x8xf32> -> vector<2x8x8xf32>
    "tpu.trace_stop"() : () -> ()
    %cst_6 = arith.constant 0.0883883461 : f32
    %15 = vector.broadcast %cst_6 : f32 to vector<2x8x8xf32>
    %16 = arith.mulf %14, %15 : vector<2x8x8xf32>
    %cst_7 = arith.constant dense<0xFF800000> : vector<2x8xf32>
    %17 = vector.multi_reduction <maximumf>, %16, %cst_7 [2] : vector<2x8x8xf32> to vector<2x8xf32>
    %18 = vector.shape_cast %17 : vector<2x8xf32> to vector<2x8x1xf32>
    %19 = vector.broadcast %18 : vector<2x8x1xf32> to vector<2x8x8xf32>
    %20 = arith.subf %16, %19 : vector<2x8x8xf32>
    %21 = math.exp %20 : vector<2x8x8xf32>
    %cst_8 = arith.constant dense<0.000000e+00> : vector<2x8xf32>
    %22 = vector.multi_reduction <add>, %21, %cst_8 [2] : vector<2x8x8xf32> to vector<2x8xf32>
    %23 = vector.shape_cast %22 : vector<2x8xf32> to vector<2x8x1xf32>
    %24 = vector.broadcast %23 : vector<2x8x1xf32> to vector<2x8x8xf32>
    %25 = arith.divf %21, %24 : vector<2x8x8xf32>
    "tpu.trace_start"() <{level = 10 : i32, message = "bqk,bkf->bqf"}> : () -> ()
    %cst_9 = arith.constant dense<0.000000e+00> : vector<2x8x128xf32>
    %26 = tpu.matmul %25, %11, %cst_9 {dimension_numbers = #tpu.dot_dimension_numbers<[2], [1], [1], [2], [0, 0, 0, 1, 1, 2], [0], [0]>} : vector<2x8x8xf32>, vector<2x8x128xf32>, vector<2x8x128xf32> -> vector<2x8x128xf32>
    "tpu.trace_stop"() : () -> ()
    %27 = vector.shape_cast %26 : vector<2x8x128xf32> to vector<16x128xf32>
    %cst_10 = arith.constant dense<0xFF800000> : vector<16xf32>
    %28 = vector.multi_reduction <maximumf>, %27, %cst_10 [1] : vector<16x128xf32> to vector<16xf32>
    %29 = vector.shape_cast %28 : vector<16xf32> to vector<16x1xf32>
    %cst_11 = arith.constant dense<0xFF800000> : vector<1xf32>
    %30 = vector.multi_reduction <maximumf>, %29, %cst_11 [0] : vector<16x1xf32> to vector<1xf32>
    %31 = vector.shape_cast %30 : vector<1xf32> to vector<1x1xf32>
    %cst_12 = arith.constant 2.000000e-02 : f32
    %32 = vector.broadcast %cst_12 : f32 to vector<1x1xf32>
    %33 = arith.minimumf %31, %32 : vector<1x1xf32>
    %c0_13 = arith.constant 0 : index
    %c0_14 = arith.constant 0 : index
    %34 = vector.load %arg3[%c0_13, %c0_14] : memref<1x1xf32, #tpu.memory_space<vmem>>, vector<1x1xf32>
    tpu.vector_store %arg3[%c0_13, %c0_14], %33 {strides = array<i32>} : memref<1x1xf32, #tpu.memory_space<vmem>>, vector<1x1xf32>,
    return
  }
}

</mosaic_0001>

<bundles_post_ra>
// kernel: tpu_custom_call.1
= control target key start
LH: loop header
LB: loop body
LE: loop exit
PB: predicated region body
PF: predicated region fallthrough
CT: control target
= control target key end

     0   :  { %8 = vsyncpa [#allocation3], 0  ;;  %s904_s0 = inlined_call_operand.hbm [shape: bf16[16,128], index: 0, kind: input, shape index: {}]   ;;  %s905_s1 = inlined_call_operand.hbm [shape: bf16[128,384], index: 1, kind: input, shape index: {}]   ;;  %s906_s2 = inlined_call_operand.vmem [shape: f32[1,384], index: 2, kind: input, shape index: {}]   ;;  %s907_s3 = inlined_call_operand.hbm [shape: f32[1,1], index: 3, kind: output, shape index: {}]  }
   0x1   :  { %9 = vsyncpa [#allocation6], 0 }
   0x2   :  { %10 = vsyncpa [#allocation4], 0  ;;  %s807_s12 = smov [#allocation2]   ;;  %s735_s16 = scalar_lea.hbm %s904_s0, 128 }
   0x3   :  { %s16_s13 = sshll.u32 %s807_s12, 4  ;;  %p736_p0 = scmp.ne.s32.totalorder %s904_s0, %s735_s16  ;;  %s17_s13 = int_to_ptr.vmem [resolvable:$true] %s16_s13 }
   0x4   :  { %p739_p1 = scmp.lt.u32.totalorder %s735_s16, %s904_s0 }
   0x6   :  { %p741_p2 = pnand %p739_p1, %p736_p0 }
   0x8   :  { %744 = shalt.err (!%p741_p2)
}
   0x9   :  { %s745_s21 = scalar_lea.vmem %s17_s13, 128  ;;  %p750_p4 = scmp.lt.s32.totalorder %s17_s13, %s17_s13 }
   0xa   :  { %p746_p3 = scmp.ne.s32.totalorder %s17_s13, %s745_s21  ;;  %p751_p5 = scmp.lt.s32.totalorder %s745_s21, %s745_s21 }
   0xc   :  { %p752_p6 = por %p751_p5, %p750_p4 }
   0xe   :  { %p753_p7 = pnand %p752_p6, %p746_p3 }
  0x10   :  { %756 = shalt.err (!%p753_p7)
}
  0x11   :  { %s808_s22 = smov 64   ;;  %s809_s23 = smov 4  }
  0x12   :  { %22 = dma.hbm_to_vmem [thread:$0]  %s904_s0, 128, %s17_s13, [#allocation3], %s808_s22, %s808_s22, %s809_s23  }
  0x13   :  { %s810_s26 = smov [#allocation5]   ;;  %s757_s30 = scalar_lea.hbm %s905_s1, 3072 }
  0x14   :  { %s28_s27 = sshll.u32 %s810_s26, 4  ;;  %p758_p8 = scmp.ne.s32.totalorder %s905_s1, %s757_s30  ;;  %s29_s27 = int_to_ptr.vmem [resolvable:$true] %s28_s27 }
  0x15   :  { %p761_p9 = scmp.lt.u32.totalorder %s757_s30, %s905_s1 }
  0x17   :  { %p763_p10 = pnand %p761_p9, %p758_p8 }
  0x19   :  { %766 = shalt.err (!%p763_p10)
}
  0x1a   :  { %s767_s8 = scalar_lea.vmem %s29_s27, 3072  ;;  %p772_p12 = scmp.lt.s32.totalorder %s29_s27, %s29_s27 }
  0x1b   :  { %p768_p11 = scmp.ne.s32.totalorder %s29_s27, %s767_s8  ;;  %p773_p13 = scmp.lt.s32.totalorder %s767_s8, %s767_s8 }
  0x1d   :  { %p774_p0 = por %p773_p13, %p772_p12 }
  0x1f   :  { %p775_p1 = pnand %p774_p0, %p768_p11 }
  0x21   :  { %778 = shalt.err (!%p775_p1)
}
  0x22   :  { %s811_s0 = smov 192   ;;  %s812_s9 = smov 12  }
  0x23   :  { %34 = dma.hbm_to_vmem [thread:$0]  %s905_s1, 3072, %s29_s27, [#allocation6], %s811_s0, %s811_s0, %s812_s9  }
  0x24   :  { %801 = dma.done.wait [#allocation3], 128  }
  0x25   :  { %802 = vsyncadd [#allocation3], 4294967168 }
  0x26   :  { %803 = dma.done.wait [#allocation6], 3072  }
  0x27   :  { %804 = vsyncadd [#allocation6], 4294964224  ;;  %v813_v0 = vmov 0   ;;  %v814_v1 = vmov 0.0   ;;  %v694_v2 = vld [vmem:[#allocation5 + $0x4] ss:$12 sps:$4 sm:$0xff]   ;;  %v80_v27 = vlaneseq }
  0x28   :  { %261 = vmatprep.mubr.bf16.mxu0 %v813_v0  ;;  %642 = vmatprep.subr.bf16.mxu1 %v814_v1  ;;  %v696_v3 = vld [vmem:[#allocation5] ss:$12 sps:$4 sm:$0xff]   ;;  %v697_v4 = vld [vmem:[#allocation5 + $0x1c] ss:$12 sps:$4 sm:$0xff]   ;;  %v699_v5 = vld [vmem:[#allocation5 + $0x18] ss:$12 sps:$4 sm:$0xff]  }
  0x29   :  { %229 = vmatprep.subr.bf16.mxu0 %v694_v2  ;;  %v700_v6 = vld [vmem:[#allocation5 + $0x34] ss:$12 sps:$4 sm:$0xff]   ;;  %v702_v7 = vld [vmem:[#allocation5 + $0x30] ss:$12 sps:$4 sm:$0xff]   ;;  %v703_v8 = vld [vmem:[#allocation5 + $0x4c] ss:$12 sps:$4 sm:$0xff]  }
  0x2a   :  { %230 = vmatpush1.bf16.msra.mxu0 %v696_v3  ;;  %v705_v9 = vld [vmem:[#allocation5 + $0x48] ss:$12 sps:$4 sm:$0xff]   ;;  %v706_v10 = vld [vmem:[#allocation5 + $0x64] ss:$12 sps:$4 sm:$0xff]   ;;  %v720_v12 = vld [vmem:[#allocation5 + $0x20] ss:$12 sps:$4 sm:$0xff]  }
  0x2b   :  { %231 = vmatprep.subr.bf16.mxu0 %v697_v4  ;;  %v719_v11 = vld [vmem:[#allocation5 + $0x8] ss:$12 sps:$4 sm:$0xff]   ;;  %v708_v13 = vld [vmem:[#allocation5 + $0x60] ss:$12 sps:$4 sm:$0xff]   ;;  %v721_v15 = vld [vmem:[#allocation5 + $0x38] ss:$12 sps:$4 sm:$0xff]  }
  0x2c   :  { %643 = vmatpush3.bf16.msra.mxu1 %v719_v11  ;;  %v709_v14 = vld [vmem:[#allocation5 + $0x7c] ss:$12 sps:$4 sm:$0xff]   ;;  %v711_v16 = vld [vmem:[#allocation5 + $0x78] ss:$12 sps:$4 sm:$0xff]   ;;  %v712_v17 = vld [vmem:[#allocation5 + $0x94] ss:$12 sps:$4 sm:$0xff]  }
  0x2d   :  { %644 = vmatprep.subr.bf16.mxu1 %v814_v1  ;;  %v722_v18 = vld [vmem:[#allocation5 + $0x50] ss:$12 sps:$4 sm:$0xff]   ;;  %v715_v20 = vld [vmem:[#allocation5 + $0xac] ss:$12 sps:$4 sm:$0xff]   ;;  %v723_v21 = vld [vmem:[#allocation5 + $0x68] ss:$12 sps:$4 sm:$0xff]  }
  0x2e   :  { %232 = vmatpush1.bf16.msra.mxu0 %v699_v5  ;;  %v714_v19 = vld [vmem:[#allocation5 + $0x90] ss:$12 sps:$4 sm:$0xff]   ;;  %v717_v22 = vld [vmem:[#allocation5 + $0xa8] ss:$12 sps:$4 sm:$0xff]   ;;  %v724_v24 = vld [vmem:[#allocation5 + $0x80] ss:$12 sps:$4 sm:$0xff]  }
  0x2f   :  { %233 = vmatprep.subr.bf16.mxu0 %v700_v6  ;;  %v718_v23 = vld [vmem:[#allocation2] sm:$0xff]   ;;  %vm815_vm0 = vmmov 0   ;;  %v81_v28 = vshrl.u32 %v80_v27, 7  ;;  %vm399_vm1 = vcmask 64512   ;;  %vm580_vm2 = vcmask 0  }
  0x30   :  { %645 = vmatpush3.bf16.msra.mxu1 %v720_v12  ;;  %v725_v25 = vld [vmem:[#allocation5 + $0x98] ss:$12 sps:$4 sm:$0xff]   ;;  %v726_v26 = vld [vmem:[#allocation5 + $0xb0] ss:$12 sps:$4 sm:$0xff]   ;;  %658 = vmatprep.mubr.msk.bf16.mxu1 %vm815_vm0, %v814_v1 }
  0x31   :  { %646 = vmatprep.subr.bf16.mxu1 %v814_v1  ;;  %v86_v29 = vsub.s32 1, %v81_v28  ;;  %v78_v30 = vld [vmem:[%s906_s2] sm:$0x7]  ;;  %v82_v32 = vsub.s32 0, %v81_v28  ;;  %v90_v46 = vsub.s32 2, %v81_v28  ;;  %s816_s2 = smov [#allocation7]  }
  0x32   :  { %234 = vmatpush1.bf16.msra.mxu0 %v702_v7  ;;  %s588_s13 = sshll.u32 %s816_s2, 4  ;;  %s589_s13 = int_to_ptr.vmem [resolvable:$true] %s588_s13 }
  0x33   :  { %235 = vmatprep.subr.bf16.mxu0 %v703_v8  ;;  %v87_v31 = vrot.slane %v78_v30, %v86_v29  ;;  %v83_v37 = vrot.slane %v78_v30, %v82_v32  ;;  %v91_v47 = vrot.slane %v78_v30, %v90_v46  ;;  %s779_s14 = scalar_lea.vmem %s589_s13, 16  ;;  %s783_s15 = scalar_lea.vmem %s589_s13, 32 }
  0x34   :  { %647 = vmatpush3.bf16.msra.mxu1 %v721_v15  ;;  %p780_p2 = scmp.ne.s32.totalorder %s589_s13, %s779_s14  ;;  %p784_p3 = scmp.lt.s32.totalorder %s589_s13, %s589_s13 }
  0x35   :  { %648 = vmatprep.subr.bf16.mxu1 %v814_v1  ;;  %p785_p4 = scmp.lt.s32.totalorder %s783_s15, %s779_s14 }
  0x36   :  { %236 = vmatpush1.bf16.msra.mxu0 %v705_v9 }
  0x37   :  { %237 = vmatprep.subr.bf16.mxu0 %v706_v10  ;;  %p786_p5 = por %p785_p4, %p784_p3 }
  0x38   :  { %649 = vmatpush3.bf16.msra.mxu1 %v722_v18 }
  0x39   :  { %650 = vmatprep.subr.bf16.mxu1 %v814_v1  ;;  %p787_p6 = pnand %p786_p5, %p780_p2 }
  0x3a   :  { %238 = vmatpush1.bf16.msra.mxu0 %v708_v13 }
  0x3b   :  { %239 = vmatprep.subr.bf16.mxu0 %v709_v14 }
  0x3c   :  { %651 = vmatpush3.bf16.msra.mxu1 %v723_v21 }
  0x3d   :  { %652 = vmatprep.subr.bf16.mxu1 %v814_v1 }
  0x3e   :  { %240 = vmatpush1.bf16.msra.mxu0 %v711_v16 }
  0x3f   :  { %241 = vmatprep.subr.bf16.mxu0 %v712_v17 }
  0x40   :  { %653 = vmatpush3.bf16.msra.mxu1 %v724_v24 }
  0x41   :  { %654 = vmatprep.subr.bf16.mxu1 %v814_v1 }
  0x42   :  { %242 = vmatpush1.bf16.msra.mxu0 %v714_v19 }
  0x43   :  { %243 = vmatprep.subr.bf16.mxu0 %v715_v20 }
  0x44   :  { %655 = vmatpush3.bf16.msra.mxu1 %v725_v25 }
  0x45   :  { %656 = vmatprep.subr.bf16.mxu1 %v814_v1 }
  0x46   :  { %244 = vmatpush1.bf16.msra.mxu0 %v717_v22 }
  0x47   :  { %662 = vmatprep.subr.bf16.mxu0 %v814_v1 }
  0x48   :  { %657 = vmatpush3.bf16.msra.mxu1 %v726_v26 }
  0x49   :  { %262 = vmatmul.mubr.bf16.vlgmr.msra.gmra.mrb[0].mxu0 %v718_v23  ;;  %668 = vmatprep.subr.bf16.mxu1 %v814_v1 }
  0x4a   :  { %664 = vmatprep.mubr.msk.bf16.mxu0 %vm815_vm0, %v814_v1 }
  0x4b   :  { %659 = vmatmul.mubr.bf16.vlgmr.msra.gmra.mrb[0].mxu1 %v718_v23 }
  0x4c   :  { %670 = vmatprep.mubr.msk.bf16.mxu1 %vm815_vm0, %v814_v1 }
 0x11c   :  { %v263_v33 = vpop.f32.mrb[0].mxu0 }
 0x11d   :  { %v265_v34 = vpop.f32.mrb[1].mxu0  ;;  %v264_v42 = vadd.f32 %v263_v33, %v83_v37 }
 0x11e   :  { %v266_v35 = vadd.f32 %v265_v34, %v87_v31  ;;  %v267_v36 = vpop.f32.mrb[2].mxu0  ;;  %v306_v48 = vpop.f32.mrb[0].mxu1 }
 0x11f   :  { %v269_v38 = vpop.f32.mrb[3].mxu0  ;;  %v268_v43 = vadd.f32 %v267_v36, %v83_v37  ;;  %v313_v44 = vpack.c.bf16 %v264_v42, %v264_v42  ;;  %v307_v49 = vadd.f32 %v306_v48, %v91_v47  ;;  %v660_v50 = vpop.f32.mrb[1].mxu1 }
 0x120   :  { %v315_v39 = vpack.c.bf16 %v266_v35, %v266_v35  ;;  %v270_v40 = vadd.f32 %v269_v38, %v87_v31  ;;  %v309_v51 = vpop.f32.mrb[2].mxu1 }
 0x121   :  { %v314_v45 = vpack.c.bf16 %v268_v43, %v268_v43  ;;  %v310_v52 = vadd.f32 %v309_v51, %v91_v47  ;;  %v661_v53 = vpop.f32.mrb[3].mxu1 }
 0x122   :  { %v316_v41 = vpack.c.bf16 %v270_v40, %v270_v40  ;;  %663 = vmatpush3.bf16.xpose.msra.mxu0 %v315_v39 }
 0x123   :  { %674 = vmatprep.subr.mxu0 %v814_v1 }
 0x124   :  { %669 = vmatpush3.bf16.xpose.msra.mxu1 %v316_v41 }
 0x125   :  { %679 = vmatprep.subr.mxu1 %v814_v1 }
 0x129   :  { %665 = vmatmul.mubr.bf16.vlgmr.msra.gmra.mrb[4].mxu0 %v313_v44 }
 0x12a   :  { %676 = vmatprep.mubr.msk.f32.mxu0 %vm815_vm0, %v814_v1  ;;  %675 = vmatpush3.msra.mxu0 %v307_v49 }
 0x12b   :  { %671 = vmatmul.mubr.bf16.vlgmr.msra.gmra.mrb[4].mxu1 %v314_v45 }
 0x12c   :  { %681 = vmatprep.mubr.msk.f32.mxu1 %vm815_vm0, %v814_v1  ;;  %680 = vmatpush3.msra.mxu1 %v310_v52 }
 0x1fc   :  { %v351_v54 = vpop.f32.mrb[4].mxu0 }
 0x1fd   :  { %v397_v55 = vmul.f32 0.088388346, %v351_v54  ;;  %v666_v56 = vpop.f32.mrb[5].mxu0 }
 0x1fe   :  { %v354_v57 = vpop.f32.mrb[6].mxu0  ;;  %v391_v58 = vpop.f32.mrb[4].mxu1 }
 0x1ff   :  { %v398_v59 = vmul.f32 0.088388346, %v391_v58  ;;  %v667_v60 = vpop.f32.mrb[7].mxu0  ;;  %v672_v61 = vpop.f32.mrb[5].mxu1  ;;  %v400_v62 = vsel %vm399_vm1, %v397_v55, -inf }
 0x200   :  { %v394_v63 = vpop.f32.mrb[6].mxu1  ;;  %401 = vmax.xlane.f32.xlu0 %v400_v62 }
 0x201   :  { %v673_v0 = vpop.f32.mrb[7].mxu1  ;;  %v403_v1 = vsel %vm399_vm1, %v398_v59, -inf }
 0x204   :  { %404 = vmax.xlane.f32.xlu0 %v403_v1 }
 0x28d   :  { %v402_v2 = vpop.xlane.xlu0 %401 }
 0x28e   :  { %v406_v3 = vsub.f32 %v397_v55, %v402_v2 }
 0x290   :  { %v408_v4 = vmul.f32 1.442695, %v406_v3 }
 0x291   :  { %v405_v5 = vpop.xlane.xlu0 %404 }
 0x292   :  { %727 = vpow2.f32 %v408_v4  ;;  %v407_v6 = vsub.f32 %v398_v59, %v405_v5 }
 0x294   :  { %v410_v7 = vmul.f32 1.442695, %v407_v6 }
 0x296   :  { %729 = vpow2.f32 %v410_v7 }
 0x29c   :  { %v728_v8 = vpop.eup %727 }
 0x29d   :  { %v412_v9 = vsel %vm399_vm1, %v728_v8, 0.0 }
 0x29e   :  { %413 = vadd.xlane.f32.xlu1 %v412_v9 }
 0x2a0   :  { %v730_v10 = vpop.eup %729 }
 0x2a1   :  { %v415_v11 = vsel %vm399_vm1, %v730_v10, 0.0 }
 0x2a2   :  { %416 = vadd.xlane.f32.xlu1 %v415_v11 }
 0x32b   :  { %v414_v12 = vpop.xlane.xlu1 %413 }
 0x32c   :  { %731 = vrcp.f32 %v414_v12 }
 0x32f   :  { %v417_v13 = vpop.xlane.xlu1 %416 }
 0x330   :  { %733 = vrcp.f32 %v417_v13 }
 0x336   :  { %v732_v14 = vpop.eup %731 }
 0x337   :  { %v419_v15 = vmul.f32 %v732_v14, %v728_v8 }
 0x339   :  { %677 = vmatmul.mubr.msk.f32.vlgmr.msra.gmra.mrb[8].mxu0 %vm399_vm1, %v419_v15 }
 0x33a   :  { %v734_v16 = vpop.eup %733 }
 0x33b   :  { %v421_v17 = vmul.f32 %v734_v16, %v730_v10 }
 0x33d   :  { %682 = vmatmul.mubr.msk.f32.vlgmr.msra.gmra.mrb[8].mxu1 %vm399_vm1, %v421_v17 }
 0x40c   :  { %v491_v18 = vpop.f32.mrb[8].mxu0 }
 0x40d   :  { %568 = vmax.xlane.f32.xlu0 %v491_v18  ;;  %v678_v19 = vpop.f32.mrb[9].mxu0 }
 0x410   :  { %v564_v20 = vpop.f32.mrb[8].mxu1 }
 0x411   :  { %570 = vmax.xlane.f32.xlu1 %v564_v20  ;;  %v683_v21 = vpop.f32.mrb[9].mxu1 }
 0x49a   :  { %v569_v22 = vpop.xlane.xlu0 %568 }
 0x49e   :  { %v571_v23 = vpop.xlane.xlu1 %570 }
 0x49f   :  { %v572_v24 = vmax.f32 %v569_v22, %v571_v23 }
 0x4a1   :  { %v573_v25 = vrot.slane %v572_v24, 4 }
 0x4a3   :  { %v574_v26 = vmax.f32 %v572_v24, %v573_v25 }
 0x4a5   :  { %v575_v27 = vrot.slane %v574_v26, 2 }
 0x4a7   :  { %v576_v28 = vmax.f32 %v574_v26, %v575_v27 }
 0x4a9   :  { %v577_v29 = vrot.slane %v576_v28, 1 }
 0x4ab   :  { %v578_v30 = vmax.f32 %v576_v28, %v577_v29 }
 0x4ad   :  { %v579_v31 = vmin.f32 %v578_v30, 0.02 }
 0x4af   :  { %581 = vst.msk [vmem:[#allocation7] sm:$0x1] %vm580_vm2, %v579_v31 }
 0x4b0   :  { %790 = shalt.err (!%p787_p6)
}
 0x4b1   :  { %s791_s18 = scalar_lea.hbm %s907_s3, 16 }
 0x4b2   :  { %p792_p7 = scmp.ne.s32.totalorder %s907_s3, %s791_s18  ;;  %p795_p8 = scmp.lt.u32.totalorder %s791_s18, %s907_s3 }
 0x4b4   :  { %p797_p9 = pnand %p795_p8, %p792_p7 }
 0x4b6   :  { %800 = shalt.err (!%p797_p9)
}
 0x4b7   :  { %591 = dma.vmem_to_hbm [thread:$0]  %s589_s13, 16, %s907_s3, [#allocation4]  }
 0x4b8   :  { %805 = dma.done.wait [#allocation4], 16  }
 0x4b9   :  { %806 = vsyncadd [#allocation4], 4294967280 }
 0x4ba   :  { %595 = vsyncpa [#allocation3], 1 }
 0x4bb   :  { %596 = vsyncpa [#allocation6], 1 }
 0x4bc   :  { %597 = vsyncpa [#allocation4], 1 }

</bundles_post_ra>
